<compile_context>
chip_gen: v6e
topology: v6e:2x2x1
jax: 0.10.0
libtpu: 0.0.40
codegen_flags: <defaults>
</compile_context>

<pallas_src>
import functools

import jax
import jax.numpy as jnp
import numpy as np
from jax.experimental import pallas as pl
from jax.experimental.pallas import tpu as pltpu


# ------------------------------ small helpers ------------------------------ #
def _round_up(x, m):
    return ((x + m - 1) // m) * m


def _largest_aligned_divisor(dim, preferred, align=128):
    """Largest multiple of `align` that divides `dim` and is <= preferred."""
    t = min(preferred, dim)
    t = max(align, (t // align) * align)
    while dim % t != 0:
        t -= align
    return t


@functools.lru_cache(maxsize=None)
def _vmem_limit_bytes():
    """Per-generation VMEM budget: ~75% of physical VMEM.

    128 MiB parts (v5e/v6e) -> ~96 MiB; 64 MiB parts (v7x) -> 48 MiB, leaving
    headroom for compiler-internal scratch."""
    try:
        info = pltpu.get_tpu_info()
        phys = int(getattr(info, "vmem_capacity_bytes", 64 * 1024 * 1024))
    except Exception:
        phys = 64 * 1024 * 1024  # safe fallback (v7x-sized)
    return (phys * 3) // 4


# ----------------------------- Pallas kernels ------------------------------ #
def _dense_relu_kernel(x_ref, w_ref, b_ref, o_ref, acc_ref):
    # x_ref: (tm, tk) bf16   w_ref: (tk, tn) bf16   b_ref: (1, tn) f32
    # o_ref: (tm, tn)        acc_ref: (tm, tn) f32 scratch, resident across K
    k = pl.program_id(2)
    partial = jnp.dot(x_ref[...], w_ref[...], preferred_element_type=jnp.float32)

    @pl.when(k == 0)
    def _first():
        # write-on-first-step: avoids a separate zero-init store+reload pass
        acc_ref[...] = partial

    @pl.when(k > 0)
    def _accumulate():
        acc_ref[...] += partial

    @pl.when(k == pl.num_programs(2) - 1)
    def _finalize():
        # bias + ReLU only once, off the K-accumulation critical path
        o_ref[...] = jnp.maximum(acc_ref[...] + b_ref[...], 0.0).astype(o_ref.dtype)


def _dense_relu_kernel_single_k(x_ref, w_ref, b_ref, o_ref):
    # Specialization for K fitting a single tile: no accumulator scratch at
    # all (skips the (tm, tn) f32 store+reload of acc_ref entirely).
    acc = jnp.dot(x_ref[...], w_ref[...], preferred_element_type=jnp.float32)
    o_ref[...] = jnp.maximum(acc + b_ref[...], 0.0).astype(o_ref.dtype)


def dense_relu_pallas(
    x_bf16,
    w_bf16,
    b2_f32,
    *,
    out_dtype=jnp.float32,  # pass jnp.bfloat16 to halve output HBM writeback
    tm_pref=512,
    tn_pref=512,
    tk_pref=1024,
):
    """relu(x @ w + b) with an (M, N, K)-tiled Pallas TPU kernel.

    x_bf16: (M, K) bf16, w_bf16: (K, N) bf16, b2_f32: (1, N) f32 -> (M, N).
    N and K must be multiples of 128 so every tile is lane-dense (no masked
    vst.msk); M is padded internally to a multiple of 16 (bf16 packing)."""
    M, K = x_bf16.shape
    Kw, N = w_bf16.shape
    assert K == Kw and b2_f32.shape == (1, N)
    assert N % 128 == 0, "keep the output feature dim lane-dense (multiple of 128)"
    assert K % 128 == 0, "keep the contraction dim lane-dense (multiple of 128)"

    # Pad M to a multiple of 16 (bf16 sublane packing tile).  Real deployments
    # should batch M >= 128; for tiny M the call is overhead-bound regardless.
    M_pad = _round_up(max(M, 16), 16)
    tm = min(tm_pref, M_pad)
    M_pad = _round_up(M_pad, tm)
    if M_pad != M:
        x_bf16 = jnp.pad(x_bf16, ((0, M_pad - M), (0, 0)))

    tn = _largest_aligned_divisor(N, tn_pref)
    tk = _largest_aligned_divisor(K, tk_pref)

    # Guarantee >= 2 blocks along a "parallel" grid axis so both TensorCores
    # get work on v7x (2 TC/chip).  One extra grid step costs ~0.35 us, which
    # is negligible against a potential 2x on v7x.
    if M_pad // tm == 1 and N // tn == 1 and tn >= 256:
        tn //= 2

    grid = (M_pad // tm, N // tn, K // tk)
    k_steps = grid[2]

    out_bytes = jnp.dtype(out_dtype).itemsize
    cost = pl.CostEstimate(
        flops=2 * M_pad * N * K,
        transcendentals=0,
        # Tiled re-reads: x is streamed once per N-tile column, W once per
        # M-tile row, bias once per M-tile row, output written once.
        bytes_accessed=(M_pad * K * 2) * (N // tn)
        + (K * N * 2) * (M_pad // tm)
        + (N * 4) * (M_pad // tm)
        + M_pad * N * out_bytes,
    )

    if k_steps == 1:
        kernel = _dense_relu_kernel_single_k
        scratch = []
    else:
        kernel = _dense_relu_kernel
        scratch = [pltpu.VMEM((tm, tn), jnp.float32)]

    # TODO(synk): on v5e, if profiling shows exposed weight DMA, switch
    # in_specs[1] to pipeline_mode=pl.Buffered(3); on v7x an fp8 weight copy
    # would halve weight HBM bytes (v7x MXU supports fp8, not int8).
    out = pl.pallas_call(
        kernel,
        out_shape=jax.ShapeDtypeStruct((M_pad, N), out_dtype),
        grid=grid,
        in_specs=[
            pl.BlockSpec((tm, tk), lambda i, j, k: (i, k)),
            pl.BlockSpec((tk, tn), lambda i, j, k: (k, j)),
            pl.BlockSpec((1, tn), lambda i, j, k: (0, j)),
        ],
        out_specs=pl.BlockSpec((tm, tn), lambda i, j, k: (i, j)),
        scratch_shapes=scratch,
        compiler_params=pltpu.CompilerParams(
            # M, N parallel (megacore sharding on v7x), K is the reduction.
            dimension_semantics=("parallel", "parallel", "arbitrary"),
            vmem_limit_bytes=_vmem_limit_bytes(),
        ),
        cost_estimate=cost,
    )(x_bf16, w_bf16, b2_f32)

    return out[:M] if M_pad != M else out


@jax.jit
def _dense_relu_fwd(x, w_bf16, b2):
    # Only the activation is cast per call (it arrives f32 at the module
    # boundary); the weight matrix is pre-cast to bf16 once at module init.
    return dense_relu_pallas(x.astype(jnp.bfloat16), w_bf16, b2)


# ------------------- Wrapped "JAX module" (Flax-style) -------------------- #
class DenseReluJaxModule:
    """Tiny Flax-like module: exposes .params and is callable on jnp arrays."""

    def __init__(self, in_features, out_features, key):
        k_w, k_b = jax.random.split(key)
        w = (
            jax.random.normal(k_w, (in_features, out_features), jnp.float32)
            / np.sqrt(in_features)
        )
        b = jax.random.normal(k_b, (out_features,), jnp.float32) * 0.01
        self.params = {"dense": {"kernel": w, "bias": b}}
        # Pre-computed once, outside the hot path (perf feedback): bf16 weight
        # copy for the MXU and the (1, N) bias view.
        self._kernel_bf16 = w.astype(jnp.bfloat16)
        self._bias_2d = b.reshape(1, out_features)

    def __call__(self, x):
        y = _dense_relu_fwd(x, self._kernel_bf16, self._bias_2d)
        # Structured (tuple) output so the wrapper's flattening path runs,
        # just like JaxModule.forward expects.
        return (y,)


# --------------------------- JaxModule wrapper ----------------------------- #
def flatten_structured_output(outputs):
    flat = []
    for out in outputs:
        if isinstance(out, (list, tuple)):
            flat.extend(flatten_structured_output(list(out)))
        elif isinstance(out, dict):
            flat.extend(flatten_structured_output(list(out.values())))
        else:
            flat.append(out)
    return flat


class JaxModule:
    """Mirror of forge.module.JaxModule without the torch dependency."""

    def __init__(self, name, module):
        self.name = name
        self.module = module
        self.input_names = []
        self.is_loss = False

    def get_name(self):
        return self.name

    def call(self, *args, **kwargs):
        return self.forward(*args, **kwargs)

    def forward(self, *args, **kwargs):
        # Original: jnp.asarray(x.detach().numpy()); jnp.asarray is a no-op
        # for arrays already on device, so no host round-trip per call.
        args = [jnp.asarray(x) for x in args]
        outputs = self.module(*args, **kwargs)
        outputs = flatten_structured_output([outputs])
        # TODO(synk): torch tensor round-trip (to_pt_tensors) has no Pallas
        # equivalent; returning device jax arrays (no per-call D2H sync).
        return list(outputs)

    def cpu_eval_forward(self, *args, **kwargs):
        return self.forward(*args, **kwargs)

    def get_parameters(self):
        parameters = []

        def _set_parameters(d, prefix=""):
            for key, value in d.items():
                if isinstance(value, dict):
                    _set_parameters(value, f"{prefix}{key}.")
                else:
                    # TODO(synk): original wraps in torch Parameter; use numpy.
                    parameters.append((f"{prefix}{key}", np.asarray(value)))

        if hasattr(self.module, "params"):
            _set_parameters(self.module.params)
        return parameters


# --------------------------------- main ------------------------------------ #
if __name__ == "__main__":
    key = jax.random.PRNGKey(0)
    k_param, k_x = jax.random.split(key)

    # Small demo shape; feature dims stay multiples of 128 for lane-dense
    # tiles.  (Tiny M is padded to 16 inside the kernel wrapper; real
    # workloads should batch M >= 128.)
    batch, in_features, out_features = 8, 256, 256
    inner = DenseReluJaxModule(in_features, out_features, k_param)
    mod = JaxModule("jax_dense_relu", inner)

    x = jax.random.normal(k_x, (batch, in_features), jnp.float32)

    outs = mod.forward(x)
    y = jax.block_until_ready(outs[0])

    # Reference in plain JAX with the same bf16 inputs / f32 accumulation.
    ref = jnp.maximum(
        jnp.dot(
            x.astype(jnp.bfloat16),
            inner._kernel_bf16,
            preferred_element_type=jnp.float32,
        )
        + inner.params["dense"]["bias"],
        0.0,
    )
    np.testing.assert_allclose(
        np.asarray(y), np.asarray(ref), rtol=2e-5, atol=2e-5
    )

    # Exercise parameter enumeration path too.
    _ = mod.get_parameters()

    print("KERNEL_OK")
</pallas_src>

<mosaic_0001>
module attributes {stable_mosaic.version = 11 : i64} {
  func.func @_dense_relu_kernel_single_k(%arg0: i32, %arg1: i32, %arg2: i32, %arg3: memref<16x256xbf16, #tpu.memory_space<vmem>>, %arg4: memref<256x128xbf16, #tpu.memory_space<vmem>>, %arg5: memref<1x128xf32, #tpu.memory_space<vmem>>, %arg6: memref<16x128xf32, #tpu.memory_space<vmem>>) attributes {dimension_semantics = [#tpu.dimension_semantics<parallel>, #tpu.dimension_semantics<parallel>, #tpu.dimension_semantics<arbitrary>], iteration_bounds = array<i64: 1, 2, 1>, scalar_prefetch = 0 : i64, scratch_operands = 0 : i64, tpu.core_type = #tpu.core_type<tc>, window_params = [{transform_indices = @transform_0, window_bounds = array<i64: 16, 256>}, {transform_indices = @transform_1, window_bounds = array<i64: 256, 128>}, {transform_indices = @transform_2, window_bounds = array<i64: 1, 128>}, {transform_indices = @transform_3, window_bounds = array<i64: 16, 128>}]} {
    %c0 = arith.constant 0 : index
    %c0_0 = arith.constant 0 : index
    %0 = vector.load %arg3[%c0, %c0_0] : memref<16x256xbf16, #tpu.memory_space<vmem>>, vector<16x256xbf16>
    %c0_1 = arith.constant 0 : index
    %c0_2 = arith.constant 0 : index
    %1 = vector.load %arg4[%c0_1, %c0_2] : memref<256x128xbf16, #tpu.memory_space<vmem>>, vector<256x128xbf16>
    %cst = arith.constant dense<0.000000e+00> : vector<16x128xf32>
    %2 = tpu.matmul %0, %1, %cst {dimension_numbers = #tpu.dot_dimension_numbers<[1], [0], [0], [1], [0, 0, 1, 1], [], []>} : vector<16x256xbf16>, vector<256x128xbf16>, vector<16x128xf32> -> vector<16x128xf32>
    %c0_3 = arith.constant 0 : index
    %c0_4 = arith.constant 0 : index
    %3 = vector.load %arg5[%c0_3, %c0_4] : memref<1x128xf32, #tpu.memory_space<vmem>>, vector<1x128xf32>
    %4 = vector.broadcast %3 : vector<1x128xf32> to vector<16x128xf32>
    %5 = arith.addf %2, %4 : vector<16x128xf32>
    %cst_5 = arith.constant 0.000000e+00 : f32
    %6 = vector.broadcast %cst_5 : f32 to vector<16x128xf32>
    %7 = arith.maximumf %5, %6 : vector<16x128xf32>
    %c0_6 = arith.constant 0 : index
    %c0_7 = arith.constant 0 : index
    %8 = vector.load %arg6[%c0_6, %c0_7] : memref<16x128xf32, #tpu.memory_space<vmem>>, vector<16x128xf32>
    tpu.vector_store %arg6[%c0_6, %c0_7], %7 {strides = array<i32>} : memref<16x128xf32, #tpu.memory_space<vmem>>, vector<16x128xf32>,
    return
  }
  func.func @transform_0(%arg0: i32, %arg1: i32, %arg2: i32) -> (i32, i32) {
    %c0_i32 = arith.constant 0 : i32
    return %arg0, %arg2 : i32, i32
  }
  func.func @transform_1(%arg0: i32, %arg1: i32, %arg2: i32) -> (i32, i32) {
    %c0_i32 = arith.constant 0 : i32
    return %arg2, %arg1 : i32, i32
  }
  func.func @transform_2(%arg0: i32, %arg1: i32, %arg2: i32) -> (i32, i32) {
    %c0_i32 = arith.constant 0 : i32
    %c0_i32_0 = arith.constant 0 : i32
    return %c0_i32, %arg1 : i32, i32
  }
  func.func @transform_3(%arg0: i32, %arg1: i32, %arg2: i32) -> (i32, i32) {
    %c0_i32 = arith.constant 0 : i32
    return %arg0, %arg1 : i32, i32
  }
}

</mosaic_0001>

<bundles_post_ra>
// kernel: _dense_relu_fwd.1
= control target key start
LH: loop header
LB: loop body
LE: loop exit
PB: predicated region body
PF: predicated region fallthrough
CT: control target
= control target key end

     0   :  { %8 = vsyncpa [#allocation3], 0  ;;  %s989_s0 = inlined_call_operand.vmem [shape: bf16[16,256], index: 0, kind: input, shape index: {}]   ;;  %s990_s1 = inlined_call_operand.hbm [shape: bf16[256,256], index: 1, kind: input, shape index: {}]   ;;  %s991_s2 = inlined_call_operand.vmem [shape: f32[1,256], index: 2, kind: input, shape index: {}]   ;;  %s992_s3 = inlined_call_operand.vmem [shape: f32[16,256], index: 3, kind: output, shape index: {}]  }
   0x1   :  { %10 = vsyncpa [#allocation3 + $0x1], 0  ;;  %s852_s12 = smov 0   ;;  %s854_s13 = smov 0  }
   0x2   :  { %s856_s14 = smov 0   ;;  %s858_s15 = smov 0  }
   0x3   :  { %s860_s16 = smov 0   ;;  %s862_s17 = smov 0  }
   0x4 LB: > { %s616_s18 = sadd.s32 4294967295, %s826_s17   ;;  %s31_s19 = sadd.s32 1, %s822_s16  ;;  %s826_s17 = sphi %s862_s17, %s16_s17   ;;  %s822_s16 = sphi %s860_s16, %s1001_s16   ;;  %s818_s15 = sphi %s858_s15, %s1000_s15   ;;  %s814_s14 = sphi %s856_s14, %s999_s14   ;;  %s810_s13 = sphi %s854_s13, %s998_s13   ;;  %s806_s12 = sphi %s852_s12, %s997_s12  }
   0x5   : > { %p33_p0 = scmp.ge.s32.totalorder %s31_s19, 2  ;;  %s72_s20 = sadd.s32 1, %s814_s14 }
   0x6   : > { %p79_p1 = scmp.ne.s32.totalorder %s814_s14, %s810_s13  ;;  %p80_p2 = scmp.eq.s32.totalorder %s826_s17, 0 }
   0x7   : > { %s1003_s19 = smov (%p33_p0, %s31_s19), 0  ;;  %p85_p4 = scmp.ne.s32.totalorder %s810_s13, %s806_s12 }
   0x8   : > { %p888_p3 = por %p80_p2, %p79_p1  ;;  %s68_s22 = ssub.s32 %s822_s16, %s1003_s19 }
   0x9   : > { %p86_p5 = scmp.eq.s32.totalorder %s616_s18, 0  ;;  %p70_p6 = scmp.eq.s32.totalorder %s68_s22, 0 }
   0xa   : > { %p137_p7 = scmp.eq.s32.totalorder %s616_s18, 1  ;;  %p677_p10 = scmp.lt.s32.totalorder %s826_s17, 2 }
   0xb   : > { %p895_p8 = por %p86_p5, %p85_p4  ;;  %s178_s26 = sand.u32 1, %s814_s14  }
   0xc   : > { %s900_s24 = scalar_select %p70_p6, %s814_s14, %s72_s20  }
   0xd   : > { %p902_p9 = por %p137_p7, %p79_p1  ;;  %s622_s27 = sshll.u32 %s822_s16, 6 }
   0xe   : > { %s621_s28 = sshll.u32 %s178_s26, 7  ;;  %s190_s4 = scalar_lea.hbm %s990_s1, %s622_s27 }
   0xf   : > { %s182_s5 = scalar_lea.vmem [#allocation2], %s621_s28  ;;  %p914_p11 = pnand %p677_p10, %p888_p3 }
  0x10   : > { %s191_s6 = sshll.u32 %s182_s5, 4  ;;  %p623_p12 = scmp.ge.s32.totalorder %s826_s17, 1  ;;  %s192_s6 = int_to_ptr.vmem [resolvable:$true] %s191_s6 }
  0x11   : > { %s179_s8 = scalar_lea.sflag [#allocation3], %s178_s26  ;;  %p750_p13 = pneg %p914_p11 }
  0x12   : > { %s761_s9 = scalar_lea.vmem %s192_s6, 2048  ;;  %s828_s10 = smov [#allocation2]  }
  0x13   : > { %p762_p0 = scmp.ne.s32.totalorder %s192_s6, %s761_s9  ;;  %s766_s11 = sshll.u32 %s828_s10, 4  ;;  %s767_s11 = int_to_ptr.vmem [resolvable:$false] %s766_s11 }
  0x14   : > { %s768_s12 = scalar_lea.vmem %s767_s11, 4096  ;;  %p769_p4 = scmp.lt.s32.totalorder %s192_s6, %s767_s11 }
  0x15   : > { %p764_p1 = pnand %p762_p0, %p750_p13  ;;  %p770_p5 = scmp.lt.s32.totalorder %s768_s12, %s761_s9 }
  0x17   : > { %p765_p2 = pneg %p764_p1  ;;  %p771_p3 = por %p770_p5, %p769_p4 }
  0x19   : > { %p772_p6 = pnand %p771_p3, %p765_p2 }
  0x1b   : > { %775 = shalt.err (!%p772_p6)
}
  0x1c   : > { %s829_s18 = smov 128   ;;  %s830_s20 = smov 64  }
  0x1d   : > { %s831_s21 = smov 4   ;;  %p205_p7 = scmp.lt.s32.totalorder %s826_s17, 3 }
  0x1e   : > { %676 = dma.hbm_to_vmem [thread:$0]  (!%p914_p11), %s190_s4, 2048, %s192_s6, %s179_s8, %s829_s18, %s830_s20, %s831_s21  }
  0x1f   : > { %p206_p10 = pnand %p623_p12, %p205_p7 }
  0x20   : > { %s927_s22 = sand.u32 (!%p206_p10), 1, %s810_s13  }
  0x21   : > { %209 = sbr.rel (%p206_p10) target bundleno = 286 (0x11e), region = 32  ;;  %s624_s26 = sshll.u32 (!%p206_p10), %s927_s22, 7 }
  0x22   : > { %s212_s27 = scalar_lea.sflag (!%p206_p10), [#allocation3], %s927_s22  ;;  %s931_s28 = scalar_lea.vmem (!%p206_p10), [#allocation2], %s624_s26 }
  0x26   : > { %801 = dma.done.wait (%p895_p8), %s212_s27, 2048  }
  0x27   : > { %803 = vsyncadd (%p895_p8), %s212_s27, 4294965248  ;;  %v729_v0 = vld [vmem:[%s931_s28 + $0x78] sm:$0xff]   ;;  %v731_v2 = vld [vmem:[%s931_s28 + $0x70] sm:$0xff]   ;;  %p263_p8 = scmp.lt.s32.totalorder %s818_s15, 1  ;;  %s625_s9 = sshll.u32 %s927_s22, 4 }
  0x28   : > { %v730_v1 = vld [vmem:[%s931_s28 + $0x38] sm:$0xff]   ;;  %649 = vmatprep.subr.bf16.mxu0 %v729_v0  ;;  %v732_v3 = vld [vmem:[%s931_s28 + $0x30] sm:$0xff]   ;;  %v733_v4 = vld [vmem:[%s931_s28 + $0x68] sm:$0xff]   ;;  %s249_s10 = scalar_lea.vmem [#allocation4], %s625_s9  ;;  %s646_s11 = sshll.u32 (%p902_p9), %s818_s15, 3 }
  0x29   : > { %650 = vmatpush3.bf16.msra.mxu0 %v730_v1  ;;  %v734_v5 = vld [vmem:[%s931_s28 + $0x28] sm:$0xff]   ;;  %v735_v6 = vld [vmem:[%s931_s28 + $0x60] sm:$0xff]   ;;  %v737_v8 = vld [vmem:[%s931_s28 + $0x58] sm:$0xff]   ;;  %s264_s5 = scalar_select %p263_p8, %s818_s15, 1 }
  0x2a   : > { %651 = vmatprep.subr.bf16.mxu0 %v731_v2  ;;  %v736_v7 = vld [vmem:[%s931_s28 + $0x20] sm:$0xff]   ;;  %v738_v9 = vld [vmem:[%s931_s28 + $0x18] sm:$0xff]   ;;  %v739_v10 = vld [vmem:[%s931_s28 + $0x50] sm:$0xff]   ;;  %s471_s20 = scalar_lea.vmem (%p902_p9), %s992_s3, %s646_s11 }
  0x2b   : > { %v747_v11 = vld [vmem:[%s989_s0 + $0x4] ss:$8 sps:$4 sm:$0xff]   ;;  %v740_v12 = vld [vmem:[%s931_s28 + $0x10] sm:$0xff]   ;;  %v745_v17 = vld [vmem:[%s989_s0] ss:$8 sps:$4 sm:$0xff]   ;;  %s265_s8 = scalar_lea.vmem %s991_s2, %s264_s5 }
  0x2c   : > { %447 = vmatprep.mubr.bf16.mxu0 %v747_v11  ;;  %v741_v13 = vld [vmem:[%s931_s28 + $0x48] sm:$0xff]   ;;  %v743_v15 = vld [vmem:[%s931_s28 + $0x40] sm:$0xff]  }
  0x2d   : > { %652 = vmatpush3.bf16.msra.mxu0 %v732_v3  ;;  %v742_v14 = vld [vmem:[%s931_s28 + $0x8] sm:$0xff]   ;;  %v744_v16 = vld [vmem:[%s931_s28] sm:$0xff]  }
  0x2e   : > { %653 = vmatprep.subr.bf16.mxu0 %v733_v4  ;;  %v626_v19 = vld [vmem:[%s265_s8] ss:$0 sm:$0xff] }
  0x31   : > { %654 = vmatpush3.bf16.msra.mxu0 %v734_v5 }
  0x32   : > { %655 = vmatprep.subr.bf16.mxu0 %v735_v6 }
  0x35   : > { %656 = vmatpush3.bf16.msra.mxu0 %v736_v7 }
  0x36   : > { %657 = vmatprep.subr.bf16.mxu0 %v737_v8 }
  0x39   : > { %658 = vmatpush3.bf16.msra.mxu0 %v738_v9 }
  0x3a   : > { %659 = vmatprep.subr.bf16.mxu0 %v739_v10 }
  0x3d   : > { %660 = vmatpush3.bf16.msra.mxu0 %v740_v12 }
  0x3e   : > { %661 = vmatprep.subr.bf16.mxu0 %v741_v13 }
  0x41   : > { %662 = vmatpush3.bf16.msra.mxu0 %v742_v14 }
  0x42   : > { %663 = vmatprep.subr.bf16.mxu0 %v743_v15 }
  0x45   : > { %664 = vmatpush3.bf16.msra.mxu0 %v744_v16 }
  0x48   : > { %448 = vmatmul.mubr.bf16.vlgmr.msra.gmra.mxu0 %v745_v17 }
 0x108   : > { %v665_v18 = vpop.f32.mrf.mxu0 }
 0x10a   : > { %v666_v20 = vpop.f32.mrf.mxu0 }
 0x10b   : > { %v667_v21 = vadd.f32 %v666_v20, %v665_v18 }
 0x10c   : > { %v668_v22 = vpop.f32.mrf.mxu0 }
 0x10d   : > { %v450_v23 = vadd.f32 %v667_v21, %v626_v19 }
 0x10e   : > { %v669_v24 = vpop.f32.mrf.mxu0 }
 0x10f   : > { %v456_v25 = vmax.f32 %v450_v23, 0.0  ;;  %v670_v26 = vadd.f32 %v669_v24, %v668_v22 }
 0x111   : > { %458 = vst [vmem:[%s249_s10] sm:$0xff] %v456_v25  ;;  %v453_v27 = vadd.f32 %v670_v26, %v626_v19  ;;  %466 = sbr.rel (!%p902_p9) target bundleno = 286 (0x11e), region = 40 }
 0x113   : > { %v457_v28 = vmax.f32 %v453_v27, 0.0 }
 0x115   : > { %459 = vst [vmem:[%s249_s10 + $0x8] sm:$0xff] %v457_v28 }
 0x118   : > { %v502_v29 = vld [vmem:[%s249_s10] sm:$0xff] }
 0x119   : > { %503 = vst [vmem:[%s471_s20] sm:$0xff] %v502_v29 }
 0x11c   : > { %v504_v30 = vld [vmem:[%s249_s10 + $0x8] sm:$0xff] }
 0x11d   : > { %505 = vst [vmem:[%s471_s20 + $0x10] sm:$0xff] %v504_v30 }
 0x11e PF: > { %s16_s17 = sadd.s32 1, %s826_s17   ;;  %s997_s12 = smov %s810_s13 }
 0x11f   : > { %p13_p11 = scmp.ge.s32.totalorder %s16_s17, 4   ;;  %s998_s13 = smov %s814_s14 }
 0x120   : > { %s999_s14 = smov %s900_s24  ;;  %s1000_s15 = smov %s822_s16 }
 0x121   : > { %s1001_s16 = smov %s1003_s19  ;;  %15 = sbr.rel (!%p13_p11) target bundleno = 4 (0x4), region = 116 }
 0x126   :  { %521 = vsyncpa [#allocation3], 1 }
 0x127   :  { %523 = vsyncpa [#allocation3 + $0x1], 1 }

</bundles_post_ra>
